<compile_context>
chip_gen: v5e
topology: v5e:2x2
jax: 0.10.0
libtpu: 0.0.40
codegen_flags: <defaults>
</compile_context>

<pallas_src>
import functools
import math

import jax
import jax.numpy as jnp
from jax.experimental import pallas as pl
from jax.experimental.pallas import tpu as pltpu


def _round_up(v: int, m: int) -> int:
    return ((v + m - 1) // m) * m


def _sinusoidal_kernel_phase(x_ref, out_ref, *, half_dim: int, scale: float):
    """Single-store variant (any half_dim).

    x_ref: (tb, 1) f32; out_ref: (tb, dim) f32, dim = 2*half_dim.
    Uses cos(t) = sin(t + pi/2) so the concat disappears into one store.
    """
    dim = 2 * half_dim
    lane = jax.lax.broadcasted_iota(jnp.int32, (1, dim), 1)
    in_first_half = lane < half_dim
    k = jnp.where(in_first_half, lane, lane - half_dim).astype(jnp.float32)
    freqs = jnp.exp(k * jnp.float32(-scale))                        # (1, dim)
    phase = jnp.where(in_first_half, jnp.float32(0.0),
                      jnp.float32(math.pi / 2.0))                   # (1, dim)
    out_ref[...] = jnp.sin(x_ref[...] * freqs + phase).astype(out_ref.dtype)


def _sinusoidal_kernel_split(x_ref, out_ref, *, half_dim: int, scale: float):
    """Two-store variant (half_dim % 128 == 0 -> both stores lane-dense).

    x_ref: (tb, 1) f32; out_ref: (tb, 2*half_dim) f32.
    emb computed once on the half width; exact sin/cos (no phase trick).
    """
    k = jax.lax.broadcasted_iota(jnp.int32, (1, half_dim), 1).astype(jnp.float32)
    freqs = jnp.exp(k * jnp.float32(-scale))                        # (1, half)
    emb = x_ref[...] * freqs                                        # (tb, half)
    out_ref[:, :half_dim] = jnp.sin(emb).astype(out_ref.dtype)
    out_ref[:, half_dim:] = jnp.cos(emb).astype(out_ref.dtype)


def diffusion_sinusoidal_pos_emb(x: jax.Array, dim: int) -> jax.Array:
    """x: (B,) float timesteps -> (B, dim) sinusoidal embeddings (float32)."""
    assert dim % 2 == 0, "dim must be even"
    # dim == 2 would divide by zero below (the PyTorch module does too).
    assert dim >= 4, "dim must be >= 4 so that half_dim - 1 > 0"
    half_dim = dim // 2
    scale = math.log(10000.0) / (half_dim - 1)

    b = x.shape[0]
    x2d = x.astype(jnp.float32).reshape(b, 1)

    # ---- batch-tile selection -------------------------------------------
    # Per-row VMEM bytes: output row (dim f32) + input row padded to one
    # 128-lane vreg row, x2 for double buffering.  Budget ~12 MiB keeps
    # headroom under v5e's 16 MiB scoped-VMEM default.
    bytes_per_row = (dim * 4 + 128 * 4) * 2
    vmem_cap = max(8, ((12 * 1024 * 1024) // bytes_per_row) // 8 * 8)
    if b < 64:
        # Single block; block dims equal to the full array dims are always
        # legal (no 8/128 divisibility requirement, no padding needed).
        tb = b
    else:
        # >= 2 grid steps so the "parallel" axis splits across v7x's two
        # TensorCores; tb a multiple of 8 (sublane), capped by VMEM and 1024.
        tb = min(1024, vmem_cap, _round_up(pl.cdiv(b, 2), 8))
    grid = pl.cdiv(b, tb)

    if half_dim % 128 == 0:
        kernel = functools.partial(_sinusoidal_kernel_split,
                                   half_dim=half_dim, scale=scale)
    else:
        kernel = functools.partial(_sinusoidal_kernel_phase,
                                   half_dim=half_dim, scale=scale)

    return pl.pallas_call(
        kernel,
        out_shape=jax.ShapeDtypeStruct((b, dim), jnp.float32),
        grid_spec=pltpu.PrefetchScalarGridSpec(
            num_scalar_prefetch=0,
            grid=(grid,),
            in_specs=[pl.BlockSpec((tb, 1), lambda i: (i, 0))],
            out_specs=pl.BlockSpec((tb, dim), lambda i: (i, 0)),
        ),
        compiler_params=pltpu.CompilerParams(
            dimension_semantics=("parallel",)),
        cost_estimate=pl.CostEstimate(
            flops=4 * b * dim,
            transcendentals=b * dim,
            bytes_accessed=4 * b * (dim + 1)),
    )(x2d)


def _reference(x: jax.Array, dim: int) -> jax.Array:
    half_dim = dim // 2
    scale = math.log(10000.0) / (half_dim - 1)
    freqs = jnp.exp(jnp.arange(half_dim, dtype=jnp.float32) * -scale)
    emb = x.astype(jnp.float32)[:, None] * freqs[None, :]
    return jnp.concatenate([jnp.sin(emb), jnp.cos(emb)], axis=-1)


if __name__ == "__main__":
    key = jax.random.PRNGKey(0)

    # Case 1: dim < 128 -> phase-table kernel, single block (masked store path).
    # Case 2: half_dim % 128 == 0 -> two-store lane-dense kernel, 2 grid steps
    #         ("parallel" split across TCs on v7x) with a ragged last block
    #         (exercises the removal of the wrapper pad + out[:b] slice).
    cases = ((8, 32), (300, 256))
    for batch, dim in cases:
        # Diffusion timesteps: float scalars in [0, 1000).
        x = jax.random.uniform(jax.random.fold_in(key, dim), (batch,),
                               dtype=jnp.float32) * 1000.0
        out = jax.block_until_ready(diffusion_sinusoidal_pos_emb(x, dim))
        ref = _reference(x, dim)
        assert out.shape == (batch, dim)
        # Phase-table path evaluates cos(t) as sin(t + pi/2); for t ~ 1e3 the
        # f32 rounding of (t + pi/2) gives up to ~1e-4 of phase error, so use
        # a tolerance consistent with f32 at this argument scale.
        assert jnp.allclose(out, ref, atol=2e-4, rtol=1e-5), \
            f"mismatch vs reference (batch={batch}, dim={dim})"

    print("KERNEL_OK")
</pallas_src>

<mosaic_0001>
module attributes {stable_mosaic.version = 11 : i64} {
  func.func @_sinusoidal_kernel_phase(%arg0: i32, %arg1: memref<8x1xf32, #tpu.memory_space<vmem>>, %arg2: memref<8x32xf32, #tpu.memory_space<vmem>>) attributes {dimension_semantics = [#tpu.dimension_semantics<parallel>], iteration_bounds = array<i64: 1>, scalar_prefetch = 0 : i64, scratch_operands = 0 : i64, tpu.core_type = #tpu.core_type<tc>, window_params = [{transform_indices = @transform_0, window_bounds = array<i64: 8, 1>}, {transform_indices = @transform_1, window_bounds = array<i64: 8, 32>}]} {
    %0 = tpu.iota {dimensions = array<i32: 1>} : vector<1x32xi32>
    %c16_i32 = arith.constant 16 : i32
    %1 = vector.broadcast %c16_i32 : i32 to vector<1x32xi32>
    %2 = arith.cmpi slt, %0, %1 : vector<1x32xi32>
    %c16_i32_0 = arith.constant 16 : i32
    %3 = vector.broadcast %c16_i32_0 : i32 to vector<1x32xi32>
    %4 = arith.subi %0, %3 : vector<1x32xi32>
    %5 = arith.select %2, %0, %4 : vector<1x32xi1>, vector<1x32xi32>
    %6 = arith.sitofp %5 : vector<1x32xi32> to vector<1x32xf32>
    %cst = arith.constant -0.614022672 : f32
    %7 = vector.broadcast %cst : f32 to vector<1x32xf32>
    %8 = arith.mulf %6, %7 : vector<1x32xf32>
    %9 = math.exp %8 : vector<1x32xf32>
    %cst_1 = arith.constant 0.000000e+00 : f32
    %cst_2 = arith.constant 1.57079637 : f32
    %10 = vector.broadcast %cst_1 : f32 to vector<1x32xf32>
    %11 = vector.broadcast %cst_2 : f32 to vector<1x32xf32>
    %12 = arith.select %2, %10, %11 : vector<1x32xi1>, vector<1x32xf32>
    %c0 = arith.constant 0 : index
    %c0_3 = arith.constant 0 : index
    %13 = vector.load %arg1[%c0, %c0_3] : memref<8x1xf32, #tpu.memory_space<vmem>>, vector<8x1xf32>
    %14 = vector.broadcast %13 : vector<8x1xf32> to vector<8x32xf32>
    %15 = vector.broadcast %9 : vector<1x32xf32> to vector<8x32xf32>
    %16 = arith.mulf %14, %15 : vector<8x32xf32>
    %17 = vector.broadcast %12 : vector<1x32xf32> to vector<8x32xf32>
    %18 = arith.addf %16, %17 : vector<8x32xf32>
    %19 = math.sin %18 : vector<8x32xf32>
    %c0_4 = arith.constant 0 : index
    %c0_5 = arith.constant 0 : index
    %20 = vector.load %arg2[%c0_4, %c0_5] : memref<8x32xf32, #tpu.memory_space<vmem>>, vector<8x32xf32>
    tpu.vector_store %arg2[%c0_4, %c0_5], %19 {strides = array<i32>} : memref<8x32xf32, #tpu.memory_space<vmem>>, vector<8x32xf32>,
    return
  }
  func.func @transform_0(%arg0: i32) -> (i32, i32) {
    %c0_i32 = arith.constant 0 : i32
    %c0_i32_0 = arith.constant 0 : i32
    return %arg0, %c0_i32 : i32, i32
  }
  func.func @transform_1(%arg0: i32) -> (i32, i32) {
    %c0_i32 = arith.constant 0 : i32
    %c0_i32_0 = arith.constant 0 : i32
    return %arg0, %c0_i32 : i32, i32
  }
}

</mosaic_0001>

<bundles_post_ra>
// kernel: tpu_custom_call.1
= control target key start
LH: loop header
LB: loop body
LE: loop exit
PB: predicated region body
PF: predicated region fallthrough
CT: control target
= control target key end

     0   :  { %v242_v1 = vmov 0   ;;  %s328_s0 = inlined_call_operand.vmem [shape: f32[8,1], index: 0, kind: input, shape index: {}]   ;;  %s329_s1 = inlined_call_operand.hbm [shape: f32[8,32], index: 1, kind: output, shape index: {}]  }
   0x1   :  { %v19_v0 = vld [vmem:[%s328_s0] sm:$0xff]  ;;  %213 = vset.pattern.permute.xlu0 %v242_v1 }
   0x2   :  { %22 = vperm.xlu0 %213, %v19_v0  }
   0x3   :  { %6 = vsyncpa [#allocation3], 0  ;;  %v9_v2 = vlaneseq  ;;  %v243_v11 = vmov 1.5707964   ;;  %v244_v26 = vmov 683565275  }
   0x4   :  { %v245_v28 = vmov 2475754826   ;;  %v246_v31 = vmov 2131351028   ;;  %v247_v34 = vmov 2102212464  }
   0x5   :  { %v10_v3 = vand.u32 127, %v9_v2  ;;  %v248_v37 = vmov 920167782   ;;  %v249_v40 = vmov 1326507024   ;;  %s250_s0 = smov [#allocation2]  }
   0x6   :  { %s189_s8 = sshll.u32 %s250_s0, 4  ;;  %s191_s11 = sshll.u32 %s329_s1, 4  ;;  %s190_s8 = int_to_ptr.vmem [resolvable:$true] %s189_s8  ;;  %s192_s11 = int_to_ptr.hbm [resolvable:$true] %s191_s11 }
   0x7   :  { %v200_v4 = vadd.s32 4294967280, %v10_v3  ;;  %vm11_vm0 = vcmp.lt.s32.totalorder %v10_v3, 16 }
   0x8   :  { %v18_v12 = vsel %vm11_vm0, 0.0, %v243_v11 }
   0x9   :  { %v13_v5 = vsel %vm11_vm0, %v10_v3, %v200_v4 }
   0xa   :  { %v14_v6 = vcvt.s32.f32 %v13_v5 }
   0xc   :  { %v15_v7 = vmul.f32 -0.6140227, %v14_v6 }
   0xe   :  { %v16_v8 = vmul.f32 1.442695, %v15_v7 }
  0x10   :  { %214 = vpow2.f32 %v16_v8 }
  0x16   :  { %v215_v9 = vpop.eup %214 }
  0x74   :  { %v23_v10 = vpop.permute.xlu0 %22 }
  0x75   :  { %v25_v13 = vmul.f32 %v215_v9, %v23_v10 }
  0x77   :  { %v265_v14 = vadd.f32 %v25_v13, %v18_v12 }
  0x79   :  { %v30_v15 = vand.u32 2139095040, %v265_v14  ;;  %v27_v18 = vand.u32 2147483647, %v265_v14  ;;  %vm29_vm13 = vcmp.lt.s32.totalorder %v265_v14, 0 }
  0x7b   :  { %v31_v16 = vshrl.u32 %v30_v15, 23  ;;  %v34_v20 = vand.u32 8388607, %v27_v18  ;;  %vm28_vm14 = vcmp.le.f32.partialorder %v27_v18, 0.7853982 }
  0x7d   :  { %v201_v17 = vadd.s32 4294967169, %v31_v16  ;;  %v35_v24 = vor.u32 8388608, %v34_v20 }
  0x7f   :  { %v37_v19 = vadd.s32 1, %v201_v17  ;;  %v282_v47 = vshll.u32 %v35_v24, 8 }
  0x81   :  { %vm38_vm1 = vcmp.gt.s32.totalorder %v37_v19, 0  ;;  %v76_v56 = vand.u32 65535, %v282_v47  ;;  %v77_v61 = vshrl.u32 %v282_v47, 16 }
  0x82   :  { %v39_v21 = vsel %vm38_vm1, %v37_v19, 0 }
  0x83   :  { %v41_v22 = vand.u32 31, %v39_v21  ;;  %v273_v25 = vshrl.u32 %v39_v21, 5 }
  0x85   :  { %v271_v23 = vsub.s32 32, %v41_v22  ;;  %v44_v27 = vshll.u32 %v244_v26, %v41_v22  ;;  %v47_v29 = vshll.u32 %v245_v28, %v41_v22  ;;  %v50_v33 = vshll.u32 %v246_v31, %v41_v22 }
  0x86   :  { %v53_v36 = vshll.u32 %v247_v34, %v41_v22  ;;  %v56_v39 = vshll.u32 %v248_v37, %v41_v22  ;;  %vm59_vm2 = vcmp.lt.s32.totalorder %v273_v25, 1  ;;  %vm62_vm3 = vcmp.lt.s32.totalorder %v273_v25, 4 }
  0x87   :  { %v45_v30 = vshrl.u32 %v245_v28, %v271_v23  ;;  %v48_v32 = vshrl.u32 %v246_v31, %v271_v23  ;;  %v51_v35 = vshrl.u32 %v247_v34, %v271_v23  ;;  %v54_v38 = vshrl.u32 %v248_v37, %v271_v23 }
  0x88   :  { %v57_v41 = vshrl.u32 %v249_v40, %v271_v23  ;;  %vm61_vm4 = vcmp.lt.s32.totalorder %v273_v25, 3  ;;  %vm60_vm5 = vcmp.lt.s32.totalorder %v273_v25, 2  ;;  %v43_v20 = vshrl.u32 %v244_v26, %v271_v23 }
  0x89   :  { %v46_v42 = vor.u32 %v45_v30, %v44_v27  ;;  %v49_v43 = vor.u32 %v48_v32, %v47_v29  ;;  %v52_v44 = vor.u32 %v51_v35, %v50_v33  ;;  %v55_v45 = vor.u32 %v54_v38, %v53_v36 }
  0x8a   :  { %v58_v46 = vor.u32 %v57_v41, %v56_v39 }
  0x8b   :  { %v67_v48 = vsel %vm59_vm2, %v46_v42, %v49_v43  ;;  %v71_v49 = vsel %vm59_vm2, %v49_v43, %v52_v44  ;;  %v68_v50 = vsel %vm62_vm3, %v55_v45, 920167782  ;;  %v64_v13 = vsel %vm62_vm3, %v52_v44, 2102212464 }
  0x8c   :  { %v72_v51 = vsel %vm62_vm3, %v58_v46, 1326507024  ;;  %v69_v52 = vsel %vm61_vm4, %v52_v44, %v68_v50  ;;  %v63_v30 = vsel %vm59_vm2, %v43_v20, %v46_v42  ;;  %v65_v31 = vsel %vm61_vm4, %v49_v43, %v64_v13 }
  0x8d   :  { %v73_v53 = vsel %vm61_vm4, %v55_v45, %v72_v51  ;;  %v70_v54 = vsel %vm60_vm5, %v67_v48, %v69_v52  ;;  %v66_v23 = vsel %vm60_vm5, %v63_v30, %v65_v31  ;;  %vm182_vm2 = vcmask 261120  }
  0x8e   :  { %v74_v55 = vsel %vm60_vm5, %v71_v49, %v73_v53  ;;  %v100_v59 = vand.u32 65535, %v70_v54  ;;  %v101_v60 = vshrl.u32 %v70_v54, 16  ;;  %v120_v38 = vmul.u32 %v282_v47, %v66_v23 }
  0x8f   :  { %v78_v57 = vand.u32 65535, %v74_v55  ;;  %v79_v58 = vshrl.u32 %v74_v55, 16  ;;  %vm170_vm3 = vweird.f32 %v265_v14 }
  0x90   :  { %v103_v63 = vmul.u32 %v101_v60, %v76_v56  ;;  %v104_v2 = vmul.u32 %v100_v59, %v77_v61  ;;  %v102_v5 = vmul.u32 %v100_v59, %v76_v56  ;;  %v105_v8 = vmul.u32 %v101_v60, %v77_v61 }
  0x91   :  { %v81_v62 = vmul.u32 %v79_v58, %v76_v56  ;;  %v82_v0 = vmul.u32 %v78_v57, %v77_v61  ;;  %v80_v3 = vmul.u32 %v78_v57, %v76_v56  ;;  %v83_v7 = vmul.u32 %v79_v58, %v77_v61 }
  0x92   :  { %v106_v6 = vshll.u32 %v103_v63, 16  ;;  %v108_v10 = vshll.u32 %v104_v2, 16  ;;  %v107_v28 = vshrl.u32 %v103_v63, 16  ;;  %v109_v34 = vshrl.u32 %v104_v2, 16 }
  0x93   :  { %v84_v4 = vshll.u32 %v81_v62, 16  ;;  %v86_v9 = vshll.u32 %v82_v0, 16  ;;  %v85_v24 = vshrl.u32 %v81_v62, 16  ;;  %v87_v32 = vshrl.u32 %v82_v0, 16 }
  0x94   :  { %vm110_vm7 = vc.u32 %v102_v5, %v106_v6  ;;  %v112_v12 = vadd.s32 %v106_v6, %v102_v5 }
  0x95   :  { %vm88_vm6 = vc.u32 %v80_v3, %v84_v4  ;;  %v90_v11 = vadd.s32 %v84_v4, %v80_v3  ;;  %v111_v16 = vsel %vm110_vm7, 1, %v242_v1 }
  0x96   :  { %v89_v15 = vsel %vm88_vm6, 1, %v242_v1  ;;  %v113_v19 = vadd.s32 %v111_v16, %v105_v8  ;;  %vm114_vm9 = vc.u32 %v112_v12, %v108_v10  ;;  %v116_v36 = vadd.s32 %v112_v12, %v108_v10 }
  0x97   :  { %v91_v17 = vadd.s32 %v89_v15, %v83_v7  ;;  %vm92_vm8 = vc.u32 %v90_v11, %v86_v9  ;;  %v115_v22 = vsel %vm114_vm9, 1, %v242_v1 }
  0x98   :  { %v93_v21 = vsel %vm92_vm8, 1, %v242_v1  ;;  %v117_v29 = vadd.s32 %v115_v22, %v113_v19 }
  0x99   :  { %v95_v27 = vadd.s32 %v93_v21, %v91_v17 }
  0x9a   :  { %v118_v35 = vadd.s32 %v117_v29, %v107_v28 }
  0x9b   :  { %v96_v33 = vadd.s32 %v95_v27, %v85_v24 }
  0x9c   :  { %v119_v1 = vadd.s32 %v118_v35, %v109_v34 }
  0x9d   :  { %v97_v26 = vadd.s32 %v96_v33, %v87_v32 }
  0x9e   :  { %v123_v37 = vadd.s32 1, %v119_v1 }
  0x9f   :  { %vm122_vm10 = vc.u32 %v97_v26, %v116_v36  ;;  %v121_v50 = vadd.s32 %v116_v36, %v97_v26 }
  0xa0   :  { %v124_v39 = vsel %vm122_vm10, %v123_v37, %v119_v1 }
  0xa1   :  { %v125_v40 = vadd.s32 %v124_v39, %v120_v38 }
  0xa3   :  { %v126_v41 = vadd.s32 536870912, %v125_v40 }
  0xa5   :  { %v127_v42 = vshrl.u32 %v126_v41, 30 }
  0xa7   :  { %v128_v44 = vshll.u32 %v127_v42, 30  ;;  %v151_v63 = vsub.s32 4, %v127_v42 }
  0xa9   :  { %v129_v43 = vsub.s32 %v125_v40, %v128_v44  ;;  %v152_v5 = vsel %vm29_vm13, %v151_v63, %v127_v42 }
  0xaa   :  { %v154_v8 = vsel %vm28_vm14, 0, %v152_v5 }
  0xab   :  { %vm130_vm11 = vcmp.lt.s32.totalorder %v129_v43, 0  ;;  %v131_v45 = vsub.s32 0, %v129_v43  ;;  %v171_v13 = vadd.s32 3, %v154_v8 }
  0xad   :  { %v132_v46 = vsel %vm130_vm11, %v131_v45, %v129_v43  ;;  %v172_v19 = vand.u32 3, %v171_v13 }
  0xae   :  { %v133_v48 = vclz %v132_v46 }
  0xaf   :  { %vm174_vm15 = vcmp.eq.s32.totalorder %v172_v19, 0  ;;  %vm177_vm0 = vcmp.eq.s32.totalorder %v172_v19, 2  ;;  %vm173_vm1 = vcmp.lt.s32.totalorder %v172_v19, 2 }
  0xb0   :  { %v202_v49 = vadd.s32 4294967294, %v133_v48 }
  0xb2   :  { %vm203_vm12 = vcmp.lt.s32.totalorder %v202_v49, 0 }
  0xb3   :  { %v136_v25 = vsel %vm203_vm12, 0, %v202_v49 }
  0xb4   :  { %v137_v51 = vsub.s32 32, %v136_v25  ;;  %v141_v52 = vsub.s32 4294967266, %v136_v25  ;;  %v138_v53 = vshll.u32 %v129_v43, %v136_v25 }
  0xb6   :  { %v139_v54 = vshrl.u32 %v121_v50, %v137_v51  ;;  %v142_v55 = vadd.s32 127, %v141_v52 }
  0xb8   :  { %v140_v47 = vor.u32 %v139_v54, %v138_v53  ;;  %v143_v56 = vshll.u32 %v142_v55, 23 }
  0xba   :  { %v144_v57 = vor.u32 4788187, %v143_v56  ;;  %v147_v59 = vcvt.s32.f32 %v140_v47 }
  0xbc   :  { %v145_v58 = vand.u32 2147483647, %v144_v57 }
  0xbe   :  { %v148_v60 = vmul.f32 %v147_v59, %v145_v58 }
  0xc0   :  { %v149_v61 = vxor.u32 2147483648, %v148_v60 }
  0xc2   :  { %v150_v62 = vsel %vm29_vm13, %v149_v61, %v148_v60 }
  0xc3   :  { %v153_v0 = vsel %vm28_vm14, %v265_v14, %v150_v62 }
  0xc4   :  { %v155_v2 = vmul.f32 %v153_v0, %v153_v0 }
  0xc6   :  { %v156_v3 = vmul.f32 -0.001358992, %v155_v2  ;;  %v163_v4 = vmul.f32 -0.00019511016, %v155_v2 }
  0xc8   :  { %v157_v6 = vadd.f32 0.041655596, %v156_v3  ;;  %v164_v7 = vadd.f32 0.008332121, %v163_v4 }
  0xca   :  { %v158_v9 = vmul.f32 %v157_v6, %v155_v2  ;;  %v165_v10 = vmul.f32 %v164_v7, %v155_v2 }
  0xcc   :  { %v159_v11 = vadd.f32 -0.4999988, %v158_v9  ;;  %v166_v12 = vadd.f32 -0.16666654, %v165_v10 }
  0xce   :  { %v160_v15 = vmul.f32 %v159_v11, %v155_v2  ;;  %v167_v16 = vmul.f32 %v166_v12, %v155_v2 }
  0xd0   :  { %v161_v17 = vadd.f32 1.0, %v160_v15  ;;  %v168_v18 = vadd.f32 1.0, %v167_v16 }
  0xd2   :  { %v169_v20 = vmul.f32 %v168_v18, %v153_v0  ;;  %v178_v21 = vxor.u32 2147483648, %v161_v17 }
  0xd4   :  { %v175_v22 = vxor.u32 2147483648, %v169_v20  ;;  %v179_v27 = vsel %vm177_vm0, %v178_v21, %v169_v20 }
  0xd6   :  { %v176_v24 = vsel %vm174_vm15, %v161_v17, %v175_v22 }
  0xd7   :  { %v180_v28 = vsel %vm173_vm1, %v176_v24, %v179_v27 }
  0xd8   :  { %v181_v29 = vsel %vm170_vm3, nan, %v180_v28 }
  0xd9   :  { %183 = vst.msk [vmem:[#allocation2] sm:$0xff] %vm182_vm2, %v181_v29 }
  0xda   :  { %194 = dma.vmem_to_hbm [thread:$0]  %s190_s8, 128, %s192_s11, [#allocation3]  }
  0xdb   :  { %240 = dma.done.wait [#allocation3], 128  }
  0xdc   :  { %241 = vsyncadd [#allocation3], 4294967168 }
  0xdd   :  { %199 = vsyncpa [#allocation3], 1 }

</bundles_post_ra>
